<compile_context>
chip_gen: v6e
topology: v6e:2x2x1
jax: 0.10.0
libtpu: 0.0.40
codegen_flags: <defaults>
</compile_context>

<pallas_src>
import functools
import math
import random

import numpy as np
import jax
import jax.numpy as jnp
from jax import lax
from jax.experimental import pallas as pl
from jax.experimental.pallas import tpu as pltpu


# ----------------------------------------------------------------------------
# Generic helpers
# ----------------------------------------------------------------------------
def _vmem_limit_bytes():
    try:
        cap = int(pltpu.get_tpu_info().vmem_capacity_bytes)
    except Exception:
        cap = 64 * 1024 * 1024
    return max(16 * 1024 * 1024, min(cap * 3 // 4, 96 * 1024 * 1024))


_VMEM_LIMIT = _vmem_limit_bytes()


def _cp(*semantics):
    return pltpu.CompilerParams(dimension_semantics=tuple(semantics),
                                vmem_limit_bytes=_VMEM_LIMIT)


def _split_dot(a, b, *, split):
    """~f32-accurate matmul using two bf16 MXU passes.

    The operand named by `split` ('a' or 'b') is decomposed into bf16 hi+lo parts; the
    other operand must be exactly representable in bf16 (one-hot selectors, 2x bilinear
    0.25/0.75/0.5 weights).
    """
    if split == "a":
        hi = a.astype(jnp.bfloat16)
        lo = (a - hi.astype(jnp.float32)).astype(jnp.bfloat16)
        bb = b.astype(jnp.bfloat16)
        return (jnp.dot(hi, bb, preferred_element_type=jnp.float32)
                + jnp.dot(lo, bb, preferred_element_type=jnp.float32))
    hi = b.astype(jnp.bfloat16)
    lo = (b - hi.astype(jnp.float32)).astype(jnp.bfloat16)
    aa = a.astype(jnp.bfloat16)
    return (jnp.dot(aa, hi, preferred_element_type=jnp.float32)
            + jnp.dot(aa, lo, preferred_element_type=jnp.float32))


def _roll_by(z, delta, axis, n):
    """Return r with r[..., i, ...] = z[..., (i + delta) % n, ...] along `axis` (2-D z)."""
    amt = (-int(delta)) % n
    if amt == 0:
        return z
    native = 8 if axis == 0 else 128
    if n % native == 0:
        return pltpu.roll(z, amt, axis=axis)          # XLU rotate (fast path)
    # Small / non-aligned axes: same circular-shift semantics via slice + concat.
    lo = lax.slice_in_dim(z, n - amt, n, axis=axis)
    hi = lax.slice_in_dim(z, 0, n - amt, axis=axis)
    return lax.concatenate([lo, hi], dimension=axis)


def _pick_row_tile(h):
    """Largest multiple-of-8 divisor of h (<= 32); else h itself (full-dim block)."""
    best = None
    for r in range(8, min(h, 32) + 1, 8):
        if h % r == 0:
            best = r
    return best if best is not None else h


def _pick_batch_tile(b, h, w, target_m=256, max_bytes=4 << 20):
    """Smallest divisor of b with bb*h >= target_m (MXU M dim), under a VMEM budget."""
    divs = [d for d in range(1, b + 1) if b % d == 0]
    ok = [d for d in divs if d * h * w * 4 <= max_bytes] or [1]
    for d in ok:
        if d * h >= target_m:
            return d
    return ok[-1]


# ----------------------------------------------------------------------------
# NEAREST backward warp (rotation / translate / scale / elastic)
# ----------------------------------------------------------------------------
def _warp_kernel(idx_ref, x_ref, o_ref, *, fill):
    # idx_ref: (3, R, W) int32 rows = [src_row, src_col, oob]
    # x_ref:   (Bb, H, W) f32 ;  o_ref: (Bb, R, W) f32
    bb, h, w = x_ref.shape
    r_tile = o_ref.shape[1]

    x2d = x_ref[...].reshape(bb * h, w)
    x_hi = x2d.astype(jnp.bfloat16)
    x_lo = (x2d - x_hi.astype(jnp.float32)).astype(jnp.bfloat16)

    sy_all = idx_ref[0]
    sx_all = idx_ref[1]
    oob_all = idx_ref[2]

    iota_w = lax.broadcasted_iota(jnp.int32, (w, w), 0)   # hoisted (no per-row rebuild)
    iota_h = lax.broadcasted_iota(jnp.int32, (h, w), 0)
    fillv = jnp.float32(fill)

    for r in range(r_tile):
        sx_r = sx_all[r:r + 1, :]                          # (1, W)
        sy_r = sy_all[r:r + 1, :]
        oob_r = oob_all[r:r + 1, :]
        # Column gather: one-hot (exact in bf16) matmul; hi/lo split keeps values ~f32.
        gx = (iota_w == sx_r).astype(jnp.float32).astype(jnp.bfloat16)     # (W, W)
        cols = (jnp.dot(x_hi, gx, preferred_element_type=jnp.float32)
                + jnp.dot(x_lo, gx, preferred_element_type=jnp.float32))   # (Bb*H, W)
        # Row select: per output column pick source row sy_r (VPU mask + sublane reduce).
        gy = (iota_h == sy_r).astype(jnp.float32)                           # (H, W)
        val = jnp.sum(cols.reshape(bb, h, w) * gy[None, :, :], axis=1)      # (Bb, W)
        o_ref[:, r, :] = jnp.where(oob_r > 0, fillv, val)


@functools.partial(jax.jit, static_argnames=("fill",))
def _warp_jit(idx_3hw, x_bhw, *, fill=1.0):
    b, h, w = x_bhw.shape
    bb = _pick_batch_tile(b, h, w)
    rt = _pick_row_tile(h)
    return pl.pallas_call(
        functools.partial(_warp_kernel, fill=float(fill)),
        out_shape=jax.ShapeDtypeStruct((b, h, w), jnp.float32),
        grid=(b // bb, h // rt),
        in_specs=[pl.BlockSpec((3, rt, w), lambda bi, ri: (0, ri, 0)),
                  pl.BlockSpec((bb, h, w), lambda bi, ri: (bi, 0, 0))],
        out_specs=pl.BlockSpec((bb, rt, w), lambda bi, ri: (bi, ri, 0)),
        compiler_params=_cp("parallel", "parallel"),
    )(idx_3hw, x_bhw)


def nearest_warp(x_bhw, src_y, src_x, fill=1.0):
    """NEAREST backward warp.  src_y/src_x: (H, W) float source coordinates."""
    b, h, w = x_bhw.shape
    sy = np.rint(np.asarray(src_y, np.float64)).astype(np.int64)
    sx = np.rint(np.asarray(src_x, np.float64)).astype(np.int64)
    oob = (sy < 0) | (sy >= h) | (sx < 0) | (sx >= w)
    idx = np.stack([np.clip(sy, 0, h - 1),
                    np.clip(sx, 0, w - 1),
                    oob.astype(np.int64)]).astype(np.int32)          # (3, H, W)
    # TODO(synk): generate the source-index field on device so the 12*HW-byte H2D
    # upload overlaps compute instead of being a synchronous host pre-pass.
    return _warp_jit(jnp.asarray(idx), x_bhw, fill=float(fill))


# ----------------------------------------------------------------------------
# Separable 3x3 Gaussian blur with reflect padding (torchvision GaussianBlur)
# ----------------------------------------------------------------------------
def _blur3_kernel(g_ref, x_ref, o_ref):
    # g_ref: SMEM (2,) f32 = [side tap, center tap]; x_ref/o_ref: (1, H, W)
    h, w = x_ref.shape[1], x_ref.shape[2]
    gs = g_ref[0]
    gc = g_ref[1]
    y = x_ref[0]

    # Horizontal pass (lane shifts) with reflect edges.
    jj = lax.broadcasted_iota(jnp.int32, (h, w), 1)
    left = _roll_by(y, -1, 1, w)                  # y[:, j-1] (wraps at j == 0)
    right = _roll_by(y, +1, 1, w)                 # y[:, j+1] (wraps at j == w-1)
    l = jnp.where(jj == 0, right, left)           # reflect: x[-1] = x[1]
    r = jnp.where(jj == w - 1, left, right)       # reflect: x[w] = x[w-2]
    y = gs * l + gc * y + gs * r

    # Vertical pass (sublane shifts).
    ii = lax.broadcasted_iota(jnp.int32, (h, w), 0)
    up = _roll_by(y, -1, 0, h)
    dn = _roll_by(y, +1, 0, h)
    u = jnp.where(ii == 0, dn, up)
    d = jnp.where(ii == h - 1, up, dn)
    o_ref[0] = gs * u + gc * y + gs * d


@jax.jit
def _gaussian_blur3_jit(x_bhw, taps):
    b, h, w = x_bhw.shape
    spec = pl.BlockSpec((1, h, w), lambda bi: (bi, 0, 0))
    return pl.pallas_call(
        _blur3_kernel,
        out_shape=jax.ShapeDtypeStruct((b, h, w), jnp.float32),
        grid=(b,),
        in_specs=[pl.BlockSpec(memory_space=pltpu.MemorySpace.SMEM), spec],
        out_specs=spec,
        compiler_params=_cp("parallel"),
    )(taps, x_bhw)


def gaussian_blur3(x_bhw, sigma):
    g = np.exp(-0.5 * (np.array([-1.0, 0.0, 1.0]) / float(sigma)) ** 2)
    g = (g / g.sum()).astype(np.float32)
    taps = jnp.asarray([g[0], g[1]], jnp.float32)        # symmetric: g[0] == g[2]
    return _gaussian_blur3_jit(x_bhw, taps)


# ----------------------------------------------------------------------------
# ColorJitter (brightness + contrast, random order) fused into one kernel
# ----------------------------------------------------------------------------
def _color_jitter_kernel(fac_ref, x_ref, o_ref, *, brightness_first):
    # fac_ref: SMEM (2,) f32 = [brightness factor, contrast factor]
    y = x_ref[0]
    bf = fac_ref[0]
    cf = fac_ref[1]

    def _bright(z):
        # F.adjust_brightness on float tensors: clamp(f * x, 0, 1)
        return jnp.clip(bf * z, 0.0, 1.0)

    def _contrast(z):
        # F.adjust_contrast (1 channel): clamp(f*x + (1-f)*mean(x), 0, 1)
        m = jnp.mean(z, axis=1, keepdims=True)
        m = jnp.mean(m, axis=0, keepdims=True)
        return jnp.clip(cf * z + (1.0 - cf) * m, 0.0, 1.0)

    if brightness_first:
        y = _contrast(_bright(y))
    else:
        y = _bright(_contrast(y))
    o_ref[0] = y


@functools.partial(jax.jit, static_argnames=("brightness_first",))
def _color_jitter_jit(x_bhw, factors, *, brightness_first):
    b, h, w = x_bhw.shape
    spec = pl.BlockSpec((1, h, w), lambda bi: (bi, 0, 0))
    return pl.pallas_call(
        functools.partial(_color_jitter_kernel, brightness_first=brightness_first),
        out_shape=jax.ShapeDtypeStruct((b, h, w), jnp.float32),
        grid=(b,),
        in_specs=[pl.BlockSpec(memory_space=pltpu.MemorySpace.SMEM), spec],
        out_specs=spec,
        compiler_params=_cp("parallel"),
    )(factors, x_bhw)


def color_jitter(x_bhw, brightness, contrast, brightness_first):
    factors = jnp.asarray([brightness, contrast], jnp.float32)
    return _color_jitter_jit(x_bhw, factors, brightness_first=bool(brightness_first))


# ----------------------------------------------------------------------------
# gauss_noise_tensor: clamp(x + 0.075*(randn - 0.5), -1, 1)
# (the -0.5 bias is in the reference implementation)
# ----------------------------------------------------------------------------
_PRNG_NOISE_OK = hasattr(pltpu, "prng_seed") and hasattr(pltpu, "stateful_normal")


def _noise_prng_kernel(seed_ref, x_ref, o_ref, *, sigma):
    pltpu.prng_seed(seed_ref[0] + pl.program_id(0) * 7919)   # spread per-image streams
    n = pltpu.stateful_normal(x_ref.shape[1:], jnp.float32)
    o_ref[0] = jnp.clip(x_ref[0] + sigma * (n - 0.5), -1.0, 1.0)


def _noise_add_kernel(x_ref, n_ref, o_ref, *, sigma):
    o_ref[0] = jnp.clip(x_ref[0] + sigma * (n_ref[0] - 0.5), -1.0, 1.0)


@functools.partial(jax.jit, static_argnames=("sigma",))
def _gauss_noise_prng_jit(x_bhw, seed, sigma=0.075):
    b, h, w = x_bhw.shape
    spec = pl.BlockSpec((1, h, w), lambda bi: (bi, 0, 0))
    return pl.pallas_call(
        functools.partial(_noise_prng_kernel, sigma=float(sigma)),
        out_shape=jax.ShapeDtypeStruct((b, h, w), jnp.float32),
        grid=(b,),
        in_specs=[pl.BlockSpec(memory_space=pltpu.MemorySpace.SMEM), spec],
        out_specs=spec,
        compiler_params=_cp("parallel"),
    )(seed, x_bhw)


@functools.partial(jax.jit, static_argnames=("sigma",))
def _gauss_noise_add_jit(x_bhw, noise, sigma=0.075):
    b, h, w = x_bhw.shape
    spec = pl.BlockSpec((1, h, w), lambda bi: (bi, 0, 0))
    return pl.pallas_call(
        functools.partial(_noise_add_kernel, sigma=float(sigma)),
        out_shape=jax.ShapeDtypeStruct((b, h, w), jnp.float32),
        grid=(b,),
        in_specs=[spec, spec],
        out_specs=spec,
        compiler_params=_cp("parallel"),
    )(x_bhw, noise)


def gauss_noise(x_bhw, seed, sigma=0.075):
    global _PRNG_NOISE_OK
    if _PRNG_NOISE_OK:
        try:
            return _gauss_noise_prng_jit(x_bhw, jnp.asarray([seed], jnp.int32),
                                         sigma=float(sigma))
        except Exception:
            _PRNG_NOISE_OK = False   # fall back to a host-side RNG stream below
    noise = jax.random.normal(jax.random.PRNGKey(seed), x_bhw.shape, jnp.float32)
    return _gauss_noise_add_jit(x_bhw, noise, sigma=float(sigma))


# ----------------------------------------------------------------------------
# RandomMorphological: fused 2x bilinear up -> iterated erode/dilate -> 2x down
# ----------------------------------------------------------------------------
@functools.lru_cache(maxsize=None)
def _resize_axis_matrix(n_in, n_out):
    """cv2.resize INTER_LINEAR along one axis: src = (dst+0.5)*(n_in/n_out)-0.5, replicate."""
    m = np.zeros((n_out, n_in), np.float32)
    scale = n_in / n_out
    for o in range(n_out):
        s = (o + 0.5) * scale - 0.5
        i0 = int(math.floor(s))
        f = s - i0
        i0c = min(max(i0, 0), n_in - 1)
        i1c = min(max(i0 + 1, 0), n_in - 1)
        m[o, i0c] += 1.0 - f
        m[o, i1c] += f
    return m


@functools.lru_cache(maxsize=None)
def _resize_mats(h, w):
    uy = jnp.asarray(_resize_axis_matrix(h, 2 * h))
    uxt = jnp.asarray(_resize_axis_matrix(w, 2 * w).T.copy())
    dym = jnp.asarray(_resize_axis_matrix(2 * h, h))
    dxt = jnp.asarray(_resize_axis_matrix(2 * w, w).T.copy())
    return uy, uxt, dym, dxt


def _structuring_element(shape, size):
    """cv2.getStructuringElement(MORPH_RECT / MORPH_ELLIPSE, (size, size))."""
    if shape == "rect":
        return np.ones((size, size), bool)
    m = np.zeros((size, size), bool)
    r = size // 2
    c = size // 2
    inv_r2 = 1.0 / (r * r) if r > 0 else 0.0
    for i in range(size):
        dy = i - r
        if abs(dy) <= r:
            dx = int(round(c * math.sqrt(max(r * r - dy * dy, 0) * inv_r2)))
            j1 = max(c - dx, 0)
            j2 = min(c + dx + 1, size)
            m[i, j1:j2] = True
    return m


def _morph_kernel(uy_ref, uxt_ref, dy_ref, dxt_ref, x_ref, o_ref, *,
                  row_offs, col_offs, offsets, separable, iters, op):
    h2 = uy_ref.shape[0]
    w2 = uxt_ref.shape[1]
    reduce_fn = jnp.minimum if op == "erode" else jnp.maximum
    padval = jnp.float32(1e30 if op == "erode" else -1e30)

    # 2x bilinear upsample (separable matmuls); intermediate stays on-chip.
    y = _split_dot(_split_dot(uy_ref[...], x_ref[0], split="b"), uxt_ref[...], split="a")

    # Validity masks: a roll wraps exactly the out-of-range taps, which we replace with
    # +/-inf so they never win the min/max (cv2's default constant-border behaviour).
    ii = lax.broadcasted_iota(jnp.int32, (h2, w2), 0)
    jj = lax.broadcasted_iota(jnp.int32, (h2, w2), 1)
    rvalid = {d: (ii + d >= 0) & (ii + d < h2) for d in row_offs}
    cvalid = {e: (jj + e >= 0) & (jj + e < w2) for e in col_offs}

    for _ in range(iters):
        if separable:
            # Rect element: row pass then column pass (2k taps instead of k^2).
            acc = None
            for d in row_offs:
                tap = jnp.where(rvalid[d], _roll_by(y, d, 0, h2), padval)
                acc = tap if acc is None else reduce_fn(acc, tap)
            y = acc
            acc = None
            for e in col_offs:
                tap = jnp.where(cvalid[e], _roll_by(y, e, 1, w2), padval)
                acc = tap if acc is None else reduce_fn(acc, tap)
            y = acc
        else:
            acc = None
            for d in row_offs:
                row_shift = _roll_by(y, d, 0, h2)
                for e in [e_ for (d_, e_) in offsets if d_ == d]:
                    tap = jnp.where(rvalid[d] & cvalid[e],
                                    _roll_by(row_shift, e, 1, w2), padval)
                    acc = tap if acc is None else reduce_fn(acc, tap)
            y = acc

    # 2x bilinear downsample back to (H, W).
    o_ref[0] = _split_dot(_split_dot(dy_ref[...], y, split="b"), dxt_ref[...], split="a")


@functools.partial(jax.jit, static_argnames=("row_offs", "col_offs", "offsets",
                                             "separable", "iters", "op"))
def _morph_jit(x_bhw, uy, uxt, dym, dxt, *, row_offs, col_offs, offsets,
               separable, iters, op):
    b, h, w = x_bhw.shape
    h2, w2 = 2 * h, 2 * w
    kern = functools.partial(_morph_kernel, row_offs=row_offs, col_offs=col_offs,
                             offsets=offsets, separable=separable, iters=iters, op=op)
    return pl.pallas_call(
        kern,
        out_shape=jax.ShapeDtypeStruct((b, h, w), jnp.float32),
        grid=(b,),
        in_specs=[pl.BlockSpec((h2, h), lambda bi: (0, 0)),
                  pl.BlockSpec((w, w2), lambda bi: (0, 0)),
                  pl.BlockSpec((h, h2), lambda bi: (0, 0)),
                  pl.BlockSpec((w2, w), lambda bi: (0, 0)),
                  pl.BlockSpec((1, h, w), lambda bi: (bi, 0, 0))],
        out_specs=pl.BlockSpec((1, h, w), lambda bi: (bi, 0, 0)),
        compiler_params=_cp("parallel"),
    )(uy, uxt, dym, dxt, x_bhw)


def morphological(x_bhw, element, iters, op):
    b, h, w = x_bhw.shape
    ay, ax = element.shape[0] // 2, element.shape[1] // 2            # cv2 default anchor
    offsets = tuple(sorted((int(ky - ay), int(kx - ax))
                           for ky in range(element.shape[0])
                           for kx in range(element.shape[1]) if element[ky, kx]))
    row_offs = tuple(sorted({d for d, _ in offsets}))
    col_offs = tuple(sorted({e for _, e in offsets}))
    separable = bool(element.all())          # full rect == cartesian product of offsets
    uy, uxt, dym, dxt = _resize_mats(h, w)
    return _morph_jit(x_bhw, uy, uxt, dym, dxt, row_offs=row_offs, col_offs=col_offs,
                      offsets=offsets, separable=separable, iters=int(iters), op=op)


# ----------------------------------------------------------------------------
# OCRAugment port
# ----------------------------------------------------------------------------
class OCRAugmentPallas:
    """Pallas port of util.augmentations.OCRAugment.forward (single-channel NCHW)."""

    def __init__(self, height, width, prob=0.5, no=2, seed=0):
        self.prob = float(prob)
        self.no = int(no)
        self.h = int(height)
        self.w = int(width)
        self.rng = random.Random(seed)            # host randomness, as in the torch module
        self.np_rng = np.random.RandomState(seed)
        # Precompute per-call-invariant host tensors (feedback: no per-call meshgrids /
        # dense Gaussian builds).
        self._yy, self._xx = np.meshgrid(np.arange(self.h, dtype=np.float64),
                                         np.arange(self.w, dtype=np.float64),
                                         indexing="ij")

        def _smooth(n, sigma):
            i = np.arange(n)
            g = np.exp(-((i[:, None] - i[None, :]) ** 2) / (2.0 * sigma * sigma))
            return (g / g.sum(axis=1, keepdims=True)).astype(np.float32)

        self._el_gy = _smooth(self.h, 7.0)
        self._el_gxT = _smooth(self.w, 7.0).T.copy()

        self.augmentations = [
            self._random_rotation,        # RandomRotation(3.0, NEAREST, fill=1.0)
            self._random_translate,       # RandomAffine(0, translate=(.05,.05), NEAREST, fill=1.0)
            self._downsize,               # Downsize(): RandomAffine(scale=(.8,1)) + GaussianBlur(3, .3)
            self._elastic,                # ElasticTransform(alpha=10, sigma=7, NEAREST, fill=1.0)
            self._color_jitter,           # ColorJitter(brightness=.5, contrast=.5)
            self._random_gaussian_blur,   # GaussianBlur(3, sigma=(0.1, 1.0))
            self._gauss_noise,            # gauss_noise_tensor
            functools.partial(self._random_morph, max_size=4, max_iter=2, op="erode"),
            functools.partial(self._random_morph, max_size=2, max_iter=1, op="dilate"),
        ]

    # --- forward -------------------------------------------------------------
    def __call__(self, x):
        if self.rng.uniform(0.0, 1.0) > self.prob:
            return x
        b = x.shape[0]
        y = x.reshape(b, self.h, self.w)          # single-channel: (B,1,H,W) -> (B,H,W)
        for aug in self.rng.choices(self.augmentations, k=self.no):
            y = aug(y)
        return y.reshape(x.shape)

    # --- individual augmentations ---------------------------------------------
    def _random_rotation(self, x):
        angle = self.rng.uniform(-3.0, 3.0)
        th = math.radians(angle)
        yy, xx = self._yy, self._xx
        cy, cx = (self.h - 1) / 2.0, (self.w - 1) / 2.0
        # TODO(synk): torchvision rotates about (w/2, h/2) in grid_sample coords;
        # pixel-center rotation here can differ by <= half a pixel near edges.
        src_x = math.cos(th) * (xx - cx) + math.sin(th) * (yy - cy) + cx
        src_y = -math.sin(th) * (xx - cx) + math.cos(th) * (yy - cy) + cy
        return nearest_warp(x, src_y, src_x, fill=1.0)

    def _random_translate(self, x):
        tx = int(round(self.rng.uniform(-0.05 * self.w, 0.05 * self.w)))
        ty = int(round(self.rng.uniform(-0.05 * self.h, 0.05 * self.h)))
        return nearest_warp(x, self._yy - ty, self._xx - tx, fill=1.0)

    def _downsize(self, x):
        s = self.rng.uniform(0.8, 1.0)
        yy, xx = self._yy, self._xx
        cy, cx = (self.h - 1) / 2.0, (self.w - 1) / 2.0
        x = nearest_warp(x, (yy - cy) / s + cy, (xx - cx) / s + cx, fill=1.0)
        # TODO(synk): the sigma=0.3 blur could be fused into the warp epilogue when the
        # row tile spans the image; kept as a separate roll-based kernel for robustness.
        return gaussian_blur3(x, sigma=0.3)

    def _elastic(self, x):
        alpha = 10.0
        d = self.np_rng.uniform(-1.0, 1.0, size=(2, self.h, self.w)).astype(np.float32)
        # TODO(synk): torchvision normalizes the displacement through grid_sample coords;
        # here the smoothed field is applied directly in pixel units.
        dy = self._el_gy @ d[0] @ self._el_gxT * (alpha * 0.5)
        dx = self._el_gy @ d[1] @ self._el_gxT * (alpha * 0.5)
        return nearest_warp(x, self._yy + dy, self._xx + dx, fill=1.0)

    def _color_jitter(self, x):
        # NOTE: torchvision clamps float images to [0, 1]; the reference module applies
        # ColorJitter directly to the [-1, 1] tensor, so we reproduce that behaviour.
        bf = self.rng.uniform(0.5, 1.5)
        cf = self.rng.uniform(0.5, 1.5)
        brightness_first = self.rng.random() < 0.5
        return color_jitter(x, bf, cf, brightness_first)

    def _random_gaussian_blur(self, x):
        return gaussian_blur3(x, sigma=self.rng.uniform(0.1, 1.0))

    def _gauss_noise(self, x):
        return gauss_noise(x, seed=self.rng.randrange(1 << 30), sigma=0.075)

    def _random_morph(self, x, max_size, max_iter, op):
        size = self.rng.randint(1, max_size)       # inclusive, as random.randint in the reference
        element = _structuring_element(self.rng.choice(["rect", "ellipse"]), size)
        # TODO(synk): the reference draws iterations per image inside its python loop;
        # here a single draw is applied to the whole batch.
        iters = self.rng.randint(1, max_iter)
        # NOTE: the [-1,1] <-> [0,1] round trip in the reference commutes with the linear
        # resizes and the monotone min/max, so it is skipped.
        return morphological(x, element, iters, op)


# ----------------------------------------------------------------------------
if __name__ == "__main__":
    b, c, h, w = 2, 1, 16, 16
    key = jax.random.PRNGKey(0)
    x = jax.random.uniform(key, (b, c, h, w), jnp.float32, minval=-1.0, maxval=1.0)

    # seed=1 makes the host-side prob gate pass, so the augmentation path executes.
    aug = OCRAugmentPallas(h, w, prob=0.5, no=2, seed=1)
    y = jax.block_until_ready(aug(x))
    assert y.shape == (b, c, h, w) and y.dtype == jnp.float32

    # Exercise every augmentation kernel once so all Pallas paths compile and run.
    x3 = x.reshape(b, h, w)
    for fn in aug.augmentations:
        z = jax.block_until_ready(fn(x3))
        assert z.shape == (b, h, w) and z.dtype == jnp.float32

    print("KERNEL_OK")
</pallas_src>

<mosaic_0001>
module attributes {stable_mosaic.version = 11 : i64} {
  func.func @_morph_kernel(%arg0: i32, %arg1: memref<32x16xf32, #tpu.memory_space<vmem>>, %arg2: memref<16x32xf32, #tpu.memory_space<vmem>>, %arg3: memref<16x32xf32, #tpu.memory_space<vmem>>, %arg4: memref<32x16xf32, #tpu.memory_space<vmem>>, %arg5: memref<1x16x16xf32, #tpu.memory_space<vmem>>, %arg6: memref<1x16x16xf32, #tpu.memory_space<vmem>>) attributes {dimension_semantics = [#tpu.dimension_semantics<parallel>], iteration_bounds = array<i64: 2>, scalar_prefetch = 0 : i64, scratch_operands = 0 : i64, tpu.core_type = #tpu.core_type<tc>, window_params = [{pipeline_mode = #tpu.pipeline_mode<synchronous>, transform_indices = @transform_0, window_bounds = array<i64: 32, 16>}, {pipeline_mode = #tpu.pipeline_mode<synchronous>, transform_indices = @transform_1, window_bounds = array<i64: 16, 32>}, {pipeline_mode = #tpu.pipeline_mode<synchronous>, transform_indices = @transform_2, window_bounds = array<i64: 16, 32>}, {pipeline_mode = #tpu.pipeline_mode<synchronous>, transform_indices = @transform_3, window_bounds = array<i64: 32, 16>}, {transform_indices = @transform_4, window_bounds = array<i64: 1, 16, 16>}, {transform_indices = @transform_5, window_bounds = array<i64: 1, 16, 16>}]} {
    %c0 = arith.constant 0 : index
    %c0_0 = arith.constant 0 : index
    %0 = vector.load %arg1[%c0, %c0_0] : memref<32x16xf32, #tpu.memory_space<vmem>>, vector<32x16xf32>
    %c0_1 = arith.constant 0 : index
    %c0_2 = arith.constant 0 : index
    %c0_3 = arith.constant 0 : index
    %1 = vector.load %arg5[%c0_1, %c0_2, %c0_3] : memref<1x16x16xf32, #tpu.memory_space<vmem>>, vector<1x16x16xf32>
    %2 = vector.shape_cast %1 : vector<1x16x16xf32> to vector<16x16xf32>
    %3 = arith.truncf %2 : vector<16x16xf32> to vector<16x16xbf16>
    %4 = arith.extf %3 : vector<16x16xbf16> to vector<16x16xf32>
    %5 = arith.subf %2, %4 : vector<16x16xf32>
    %6 = arith.truncf %5 : vector<16x16xf32> to vector<16x16xbf16>
    %7 = arith.truncf %0 : vector<32x16xf32> to vector<32x16xbf16>
    %cst = arith.constant dense<0.000000e+00> : vector<32x16xf32>
    %8 = tpu.matmul %7, %3, %cst {dimension_numbers = #tpu.dot_dimension_numbers<[1], [0], [0], [1], [0, 0, 1, 1], [], []>} : vector<32x16xbf16>, vector<16x16xbf16>, vector<32x16xf32> -> vector<32x16xf32>
    %cst_4 = arith.constant dense<0.000000e+00> : vector<32x16xf32>
    %9 = tpu.matmul %7, %6, %cst_4 {dimension_numbers = #tpu.dot_dimension_numbers<[1], [0], [0], [1], [0, 0, 1, 1], [], []>} : vector<32x16xbf16>, vector<16x16xbf16>, vector<32x16xf32> -> vector<32x16xf32>
    %10 = arith.addf %8, %9 : vector<32x16xf32>
    %c0_5 = arith.constant 0 : index
    %c0_6 = arith.constant 0 : index
    %11 = vector.load %arg2[%c0_5, %c0_6] : memref<16x32xf32, #tpu.memory_space<vmem>>, vector<16x32xf32>
    %12 = arith.truncf %10 : vector<32x16xf32> to vector<32x16xbf16>
    %13 = arith.extf %12 : vector<32x16xbf16> to vector<32x16xf32>
    %14 = arith.subf %10, %13 : vector<32x16xf32>
    %15 = arith.truncf %14 : vector<32x16xf32> to vector<32x16xbf16>
    %16 = arith.truncf %11 : vector<16x32xf32> to vector<16x32xbf16>
    %cst_7 = arith.constant dense<0.000000e+00> : vector<32x32xf32>
    %17 = tpu.matmul %12, %16, %cst_7 {dimension_numbers = #tpu.dot_dimension_numbers<[1], [0], [0], [1], [0, 0, 1, 1], [], []>} : vector<32x16xbf16>, vector<16x32xbf16>, vector<32x32xf32> -> vector<32x32xf32>
    %cst_8 = arith.constant dense<0.000000e+00> : vector<32x32xf32>
    %18 = tpu.matmul %15, %16, %cst_8 {dimension_numbers = #tpu.dot_dimension_numbers<[1], [0], [0], [1], [0, 0, 1, 1], [], []>} : vector<32x16xbf16>, vector<16x32xbf16>, vector<32x32xf32> -> vector<32x32xf32>
    %19 = arith.addf %17, %18 : vector<32x32xf32>
    %20 = tpu.iota {dimensions = array<i32: 0>} : vector<32x32xi32>
    %21 = tpu.iota {dimensions = array<i32: 1>} : vector<32x32xi32>
    %c-1_i32 = arith.constant -1 : i32
    %22 = vector.broadcast %c-1_i32 : i32 to vector<32x32xi32>
    %23 = arith.addi %20, %22 : vector<32x32xi32>
    %c0_i32 = arith.constant 0 : i32
    %24 = vector.broadcast %c0_i32 : i32 to vector<32x32xi32>
    %25 = arith.cmpi sge, %23, %24 : vector<32x32xi32>
    %c-1_i32_9 = arith.constant -1 : i32
    %26 = vector.broadcast %c-1_i32_9 : i32 to vector<32x32xi32>
    %27 = arith.addi %20, %26 : vector<32x32xi32>
    %c32_i32 = arith.constant 32 : i32
    %28 = vector.broadcast %c32_i32 : i32 to vector<32x32xi32>
    %29 = arith.cmpi slt, %27, %28 : vector<32x32xi32>
    %30 = arith.andi %25, %29 : vector<32x32xi1>
    %c0_i32_10 = arith.constant 0 : i32
    %31 = vector.broadcast %c0_i32_10 : i32 to vector<32x32xi32>
    %32 = arith.addi %20, %31 : vector<32x32xi32>
    %c0_i32_11 = arith.constant 0 : i32
    %33 = vector.broadcast %c0_i32_11 : i32 to vector<32x32xi32>
    %34 = arith.cmpi sge, %32, %33 : vector<32x32xi32>
    %c0_i32_12 = arith.constant 0 : i32
    %35 = vector.broadcast %c0_i32_12 : i32 to vector<32x32xi32>
    %36 = arith.addi %20, %35 : vector<32x32xi32>
    %c32_i32_13 = arith.constant 32 : i32
    %37 = vector.broadcast %c32_i32_13 : i32 to vector<32x32xi32>
    %38 = arith.cmpi slt, %36, %37 : vector<32x32xi32>
    %39 = arith.andi %34, %38 : vector<32x32xi1>
    %c1_i32 = arith.constant 1 : i32
    %40 = vector.broadcast %c1_i32 : i32 to vector<32x32xi32>
    %41 = arith.addi %20, %40 : vector<32x32xi32>
    %c0_i32_14 = arith.constant 0 : i32
    %42 = vector.broadcast %c0_i32_14 : i32 to vector<32x32xi32>
    %43 = arith.cmpi sge, %41, %42 : vector<32x32xi32>
    %c1_i32_15 = arith.constant 1 : i32
    %44 = vector.broadcast %c1_i32_15 : i32 to vector<32x32xi32>
    %45 = arith.addi %20, %44 : vector<32x32xi32>
    %c32_i32_16 = arith.constant 32 : i32
    %46 = vector.broadcast %c32_i32_16 : i32 to vector<32x32xi32>
    %47 = arith.cmpi slt, %45, %46 : vector<32x32xi32>
    %48 = arith.andi %43, %47 : vector<32x32xi1>
    %c-1_i32_17 = arith.constant -1 : i32
    %49 = vector.broadcast %c-1_i32_17 : i32 to vector<32x32xi32>
    %50 = arith.addi %21, %49 : vector<32x32xi32>
    %c0_i32_18 = arith.constant 0 : i32
    %51 = vector.broadcast %c0_i32_18 : i32 to vector<32x32xi32>
    %52 = arith.cmpi sge, %50, %51 : vector<32x32xi32>
    %c-1_i32_19 = arith.constant -1 : i32
    %53 = vector.broadcast %c-1_i32_19 : i32 to vector<32x32xi32>
    %54 = arith.addi %21, %53 : vector<32x32xi32>
    %c32_i32_20 = arith.constant 32 : i32
    %55 = vector.broadcast %c32_i32_20 : i32 to vector<32x32xi32>
    %56 = arith.cmpi slt, %54, %55 : vector<32x32xi32>
    %57 = arith.andi %52, %56 : vector<32x32xi1>
    %c0_i32_21 = arith.constant 0 : i32
    %58 = vector.broadcast %c0_i32_21 : i32 to vector<32x32xi32>
    %59 = arith.addi %21, %58 : vector<32x32xi32>
    %c0_i32_22 = arith.constant 0 : i32
    %60 = vector.broadcast %c0_i32_22 : i32 to vector<32x32xi32>
    %61 = arith.cmpi sge, %59, %60 : vector<32x32xi32>
    %c0_i32_23 = arith.constant 0 : i32
    %62 = vector.broadcast %c0_i32_23 : i32 to vector<32x32xi32>
    %63 = arith.addi %21, %62 : vector<32x32xi32>
    %c32_i32_24 = arith.constant 32 : i32
    %64 = vector.broadcast %c32_i32_24 : i32 to vector<32x32xi32>
    %65 = arith.cmpi slt, %63, %64 : vector<32x32xi32>
    %66 = arith.andi %61, %65 : vector<32x32xi1>
    %c1_i32_25 = arith.constant 1 : i32
    %67 = vector.broadcast %c1_i32_25 : i32 to vector<32x32xi32>
    %68 = arith.addi %21, %67 : vector<32x32xi32>
    %c0_i32_26 = arith.constant 0 : i32
    %69 = vector.broadcast %c0_i32_26 : i32 to vector<32x32xi32>
    %70 = arith.cmpi sge, %68, %69 : vector<32x32xi32>
    %c1_i32_27 = arith.constant 1 : i32
    %71 = vector.broadcast %c1_i32_27 : i32 to vector<32x32xi32>
    %72 = arith.addi %21, %71 : vector<32x32xi32>
    %c32_i32_28 = arith.constant 32 : i32
    %73 = vector.broadcast %c32_i32_28 : i32 to vector<32x32xi32>
    %74 = arith.cmpi slt, %72, %73 : vector<32x32xi32>
    %75 = arith.andi %70, %74 : vector<32x32xi1>
    %c1_i32_29 = arith.constant 1 : i32
    %76 = tpu.dynamic_rotate %19 by %c1_i32_29 dim 0 : vector<32x32xf32>, i32 -> vector<32x32xf32>
    %cst_30 = arith.constant 1.000000e+30 : f32
    %77 = vector.broadcast %cst_30 : f32 to vector<32x32xf32>
    %78 = arith.select %30, %76, %77 : vector<32x32xi1>, vector<32x32xf32>
    %cst_31 = arith.constant 1.000000e+30 : f32
    %79 = vector.broadcast %cst_31 : f32 to vector<32x32xf32>
    %80 = arith.select %39, %19, %79 : vector<32x32xi1>, vector<32x32xf32>
    %81 = arith.minimumf %78, %80 : vector<32x32xf32>
    %c31_i32 = arith.constant 31 : i32
    %82 = tpu.dynamic_rotate %19 by %c31_i32 dim 0 : vector<32x32xf32>, i32 -> vector<32x32xf32>
    %cst_32 = arith.constant 1.000000e+30 : f32
    %83 = vector.broadcast %cst_32 : f32 to vector<32x32xf32>
    %84 = arith.select %48, %82, %83 : vector<32x32xi1>, vector<32x32xf32>
    %85 = arith.minimumf %81, %84 : vector<32x32xf32>
    %86 = vector.extract_strided_slice %85 {offsets = [0, 31], sizes = [32, 1], strides = [1, 1]} : vector<32x32xf32> to vector<32x1xf32>
    %87 = vector.extract_strided_slice %85 {offsets = [0, 0], sizes = [32, 31], strides = [1, 1]} : vector<32x32xf32> to vector<32x31xf32>
    %88 = tpu.concatenate %86, %87 in 1 : vector<32x1xf32>, vector<32x31xf32> -> vector<32x32xf32>
    %cst_33 = arith.constant 1.000000e+30 : f32
    %89 = vector.broadcast %cst_33 : f32 to vector<32x32xf32>
    %90 = arith.select %57, %88, %89 : vector<32x32xi1>, vector<32x32xf32>
    %cst_34 = arith.constant 1.000000e+30 : f32
    %91 = vector.broadcast %cst_34 : f32 to vector<32x32xf32>
    %92 = arith.select %66, %85, %91 : vector<32x32xi1>, vector<32x32xf32>
    %93 = arith.minimumf %90, %92 : vector<32x32xf32>
    %94 = vector.extract_strided_slice %85 {offsets = [0, 1], sizes = [32, 31], strides = [1, 1]} : vector<32x32xf32> to vector<32x31xf32>
    %95 = vector.extract_strided_slice %85 {offsets = [0, 0], sizes = [32, 1], strides = [1, 1]} : vector<32x32xf32> to vector<32x1xf32>
    %96 = tpu.concatenate %94, %95 in 1 : vector<32x31xf32>, vector<32x1xf32> -> vector<32x32xf32>
    %cst_35 = arith.constant 1.000000e+30 : f32
    %97 = vector.broadcast %cst_35 : f32 to vector<32x32xf32>
    %98 = arith.select %75, %96, %97 : vector<32x32xi1>, vector<32x32xf32>
    %99 = arith.minimumf %93, %98 : vector<32x32xf32>
    %c1_i32_36 = arith.constant 1 : i32
    %100 = tpu.dynamic_rotate %99 by %c1_i32_36 dim 0 : vector<32x32xf32>, i32 -> vector<32x32xf32>
    %cst_37 = arith.constant 1.000000e+30 : f32
    %101 = vector.broadcast %cst_37 : f32 to vector<32x32xf32>
    %102 = arith.select %30, %100, %101 : vector<32x32xi1>, vector<32x32xf32>
    %cst_38 = arith.constant 1.000000e+30 : f32
    %103 = vector.broadcast %cst_38 : f32 to vector<32x32xf32>
    %104 = arith.select %39, %99, %103 : vector<32x32xi1>, vector<32x32xf32>
    %105 = arith.minimumf %102, %104 : vector<32x32xf32>
    %c31_i32_39 = arith.constant 31 : i32
    %106 = tpu.dynamic_rotate %99 by %c31_i32_39 dim 0 : vector<32x32xf32>, i32 -> vector<32x32xf32>
    %cst_40 = arith.constant 1.000000e+30 : f32
    %107 = vector.broadcast %cst_40 : f32 to vector<32x32xf32>
    %108 = arith.select %48, %106, %107 : vector<32x32xi1>, vector<32x32xf32>
    %109 = arith.minimumf %105, %108 : vector<32x32xf32>
    %110 = vector.extract_strided_slice %109 {offsets = [0, 31], sizes = [32, 1], strides = [1, 1]} : vector<32x32xf32> to vector<32x1xf32>
    %111 = vector.extract_strided_slice %109 {offsets = [0, 0], sizes = [32, 31], strides = [1, 1]} : vector<32x32xf32> to vector<32x31xf32>
    %112 = tpu.concatenate %110, %111 in 1 : vector<32x1xf32>, vector<32x31xf32> -> vector<32x32xf32>
    %cst_41 = arith.constant 1.000000e+30 : f32
    %113 = vector.broadcast %cst_41 : f32 to vector<32x32xf32>
    %114 = arith.select %57, %112, %113 : vector<32x32xi1>, vector<32x32xf32>
    %cst_42 = arith.constant 1.000000e+30 : f32
    %115 = vector.broadcast %cst_42 : f32 to vector<32x32xf32>
    %116 = arith.select %66, %109, %115 : vector<32x32xi1>, vector<32x32xf32>
    %117 = arith.minimumf %114, %116 : vector<32x32xf32>
    %118 = vector.extract_strided_slice %109 {offsets = [0, 1], sizes = [32, 31], strides = [1, 1]} : vector<32x32xf32> to vector<32x31xf32>
    %119 = vector.extract_strided_slice %109 {offsets = [0, 0], sizes = [32, 1], strides = [1, 1]} : vector<32x32xf32> to vector<32x1xf32>
    %120 = tpu.concatenate %118, %119 in 1 : vector<32x31xf32>, vector<32x1xf32> -> vector<32x32xf32>
    %cst_43 = arith.constant 1.000000e+30 : f32
    %121 = vector.broadcast %cst_43 : f32 to vector<32x32xf32>
    %122 = arith.select %75, %120, %121 : vector<32x32xi1>, vector<32x32xf32>
    %123 = arith.minimumf %117, %122 : vector<32x32xf32>
    %c0_44 = arith.constant 0 : index
    %c0_45 = arith.constant 0 : index
    %124 = vector.load %arg3[%c0_44, %c0_45] : memref<16x32xf32, #tpu.memory_space<vmem>>, vector<16x32xf32>
    %125 = arith.truncf %123 : vector<32x32xf32> to vector<32x32xbf16>
    %126 = arith.extf %125 : vector<32x32xbf16> to vector<32x32xf32>
    %127 = arith.subf %123, %126 : vector<32x32xf32>
    %128 = arith.truncf %127 : vector<32x32xf32> to vector<32x32xbf16>
    %129 = arith.truncf %124 : vector<16x32xf32> to vector<16x32xbf16>
    %cst_46 = arith.constant dense<0.000000e+00> : vector<16x32xf32>
    %130 = tpu.matmul %129, %125, %cst_46 {dimension_numbers = #tpu.dot_dimension_numbers<[1], [0], [0], [1], [0, 0, 1, 1], [], []>} : vector<16x32xbf16>, vector<32x32xbf16>, vector<16x32xf32> -> vector<16x32xf32>
    %cst_47 = arith.constant dense<0.000000e+00> : vector<16x32xf32>
    %131 = tpu.matmul %129, %128, %cst_47 {dimension_numbers = #tpu.dot_dimension_numbers<[1], [0], [0], [1], [0, 0, 1, 1], [], []>} : vector<16x32xbf16>, vector<32x32xbf16>, vector<16x32xf32> -> vector<16x32xf32>
    %132 = arith.addf %130, %131 : vector<16x32xf32>
    %c0_48 = arith.constant 0 : index
    %c0_49 = arith.constant 0 : index
    %133 = vector.load %arg4[%c0_48, %c0_49] : memref<32x16xf32, #tpu.memory_space<vmem>>, vector<32x16xf32>
    %134 = arith.truncf %132 : vector<16x32xf32> to vector<16x32xbf16>
    %135 = arith.extf %134 : vector<16x32xbf16> to vector<16x32xf32>
    %136 = arith.subf %132, %135 : vector<16x32xf32>
    %137 = arith.truncf %136 : vector<16x32xf32> to vector<16x32xbf16>
    %138 = arith.truncf %133 : vector<32x16xf32> to vector<32x16xbf16>
    %cst_50 = arith.constant dense<0.000000e+00> : vector<16x16xf32>
    %139 = tpu.matmul %134, %138, %cst_50 {dimension_numbers = #tpu.dot_dimension_numbers<[1], [0], [0], [1], [0, 0, 1, 1], [], []>} : vector<16x32xbf16>, vector<32x16xbf16>, vector<16x16xf32> -> vector<16x16xf32>
    %cst_51 = arith.constant dense<0.000000e+00> : vector<16x16xf32>
    %140 = tpu.matmul %137, %138, %cst_51 {dimension_numbers = #tpu.dot_dimension_numbers<[1], [0], [0], [1], [0, 0, 1, 1], [], []>} : vector<16x32xbf16>, vector<32x16xbf16>, vector<16x16xf32> -> vector<16x16xf32>
    %141 = arith.addf %139, %140 : vector<16x16xf32>
    %c0_52 = arith.constant 0 : index
    %c0_53 = arith.constant 0 : index
    %c0_54 = arith.constant 0 : index
    %142 = vector.load %arg6[%c0_52, %c0_53, %c0_54] : memref<1x16x16xf32, #tpu.memory_space<vmem>>, vector<1x16x16xf32>
    %143 = vector.shape_cast %142 : vector<1x16x16xf32> to vector<16x16xf32>
    %144 = vector.shape_cast %141 : vector<16x16xf32> to vector<1x16x16xf32>
    tpu.vector_store %arg6[%c0_52, %c0_53, %c0_54], %144 {strides = array<i32>} : memref<1x16x16xf32, #tpu.memory_space<vmem>>, vector<1x16x16xf32>,
    return
  }
  func.func @transform_0(%arg0: i32) -> (i32, i32) {
    %c0_i32 = arith.constant 0 : i32
    %c0_i32_0 = arith.constant 0 : i32
    %c0_i32_1 = arith.constant 0 : i32
    return %c0_i32, %c0_i32_0 : i32, i32
  }
  func.func @transform_1(%arg0: i32) -> (i32, i32) {
    %c0_i32 = arith.constant 0 : i32
    %c0_i32_0 = arith.constant 0 : i32
    %c0_i32_1 = arith.constant 0 : i32
    return %c0_i32, %c0_i32_0 : i32, i32
  }
  func.func @transform_2(%arg0: i32) -> (i32, i32) {
    %c0_i32 = arith.constant 0 : i32
    %c0_i32_0 = arith.constant 0 : i32
    %c0_i32_1 = arith.constant 0 : i32
    return %c0_i32, %c0_i32_0 : i32, i32
  }
  func.func @transform_3(%arg0: i32) -> (i32, i32) {
    %c0_i32 = arith.constant 0 : i32
    %c0_i32_0 = arith.constant 0 : i32
    %c0_i32_1 = arith.constant 0 : i32
    return %c0_i32, %c0_i32_0 : i32, i32
  }
  func.func @transform_4(%arg0: i32) -> (i32, i32, i32) {
    %c0_i32 = arith.constant 0 : i32
    %c0_i32_0 = arith.constant 0 : i32
    %c0_i32_1 = arith.constant 0 : i32
    return %arg0, %c0_i32, %c0_i32_0 : i32, i32, i32
  }
  func.func @transform_5(%arg0: i32) -> (i32, i32, i32) {
    %c0_i32 = arith.constant 0 : i32
    %c0_i32_0 = arith.constant 0 : i32
    %c0_i32_1 = arith.constant 0 : i32
    return %arg0, %c0_i32, %c0_i32_0 : i32, i32, i32
  }
}

</mosaic_0001>

<bundles_post_ra>
// kernel: _morph_jit.1
= control target key start
LH: loop header
LB: loop body
LE: loop exit
PB: predicated region body
PF: predicated region fallthrough
CT: control target
= control target key end

     0   :  { %10 = vsyncpa [#allocation3], 0  ;;  %s1650_s0 = inlined_call_operand.vmem [shape: f32[32,16], index: 0, kind: input, shape index: {}]   ;;  %s1651_s1 = inlined_call_operand.vmem [shape: f32[16,32], index: 1, kind: input, shape index: {}]   ;;  %s1652_s2 = inlined_call_operand.vmem [shape: f32[16,32], index: 2, kind: input, shape index: {}]   ;;  %s1653_s3 = inlined_call_operand.vmem [shape: f32[32,16], index: 3, kind: input, shape index: {}]   ;;  %s1654_s4 = inlined_call_operand.vmem [shape: f32[2,16,16], index: 4, kind: input, shape index: {}]   ;;  %s1655_s5 = inlined_call_operand.hbm [shape: f32[2,16,16], index: 5, kind: output, shape index: {}]  }
   0x1   :  { %12 = vsyncpa [#allocation3 + $0x1], 0  ;;  %s1299_s18 = smov 0   ;;  %s1301_s19 = smov 0  }
   0x2   :  { %s1303_s20 = smov 0   ;;  %s1305_s21 = smov 0  }
   0x3 LB: > { %s1320_s22 = sadd.s32 4294967295, %s1258_s21   ;;  %s1045_s23 = sadd.s32 4294967294, %s1258_s21   ;;  %s1258_s21 = sphi %s1305_s21, %s1663_s21   ;;  %s1254_s20 = sphi %s1303_s20, %s1662_s20   ;;  %s1250_s19 = sphi %s1301_s19, %s1661_s19   ;;  %s1246_s18 = sphi %s1299_s18, %s1660_s18  }
   0x4   : > { %s1324_s24 = sadd.s32 1, %s1258_s21   ;;  %s135_s25 = sadd.s32 1, %s1254_s20 }
   0x5   : > { %s132_s26 = ssub.s32 %s1258_s21, %s1324_s24  ;;  %p145_p0 = scmp.ne.s32.totalorder %s1254_s20, %s1250_s19 }
   0x6   : > { %p133_p1 = scmp.eq.s32.totalorder %s132_s26, 0  ;;  %p146_p2 = scmp.eq.s32.totalorder %s1320_s22, 1 }
   0x7   : > { %p151_p3 = scmp.ne.s32.totalorder %s1250_s19, %s1246_s18  ;;  %p152_p4 = scmp.eq.s32.totalorder %s1045_s23, 1 }
   0x8   : > { %s1335_s27 = scalar_select %p133_p1, %s1254_s20, %s135_s25  }
   0x9   : > { %p1337_p5 = por %p146_p2, %p145_p0  ;;  %p1341_p6 = por %p152_p4, %p151_p3 }
   0xa   : > { %p1048_p7 = scmp.ge.s32.totalorder %s1258_s21, 1  ;;  %p190_p8 = scmp.lt.s32.totalorder %s1258_s21, 3 }
   0xc   : > { %p191_p9 = pnand %p1048_p7, %p190_p8 }
   0xd   : > { %p218_p10 = scmp.lt.s32.totalorder (!%p191_p9), %s1320_s22, 1  ;;  %s1260_s6 = smov (!%p191_p9), 127  }
   0xe   : > { %194 = sbr.rel (%p191_p9) target bundleno = 1185 (0x4a1), region = 40  ;;  %s1261_s7 = smov (!%p191_p9), 97  }
   0xf   : > { %s1262_s8 = smov (!%p191_p9), 1   ;;  %s1266_s15 = smov (!%p191_p9), [#allocation2]  }
  0x10   : > { %s1202_s16 = sshll.u32 (!%p191_p9), %s1266_s15, 4  ;;  %s1203_s16 = int_to_ptr.vmem [resolvable:$false] %s1202_s16 }
  0x11   : > { %s1204_s17 = scalar_lea.vmem (!%p191_p9), %s1203_s16, 512 }
  0x13   : > { %v224_v0 = vld [vmem:[%s1650_s0] sm:$0xff]  ;;  %v225_v1 = vld [vmem:[%s1650_s0 + $0x8] sm:$0xff]  ;;  %vm238_vm0 = vcmask 130048   ;;  %s219_s9 = scalar_select %p218_p10, %s1320_s22, 1  ;;  %v226_v3 = vld [vmem:[%s1650_s0 + $0x10] sm:$0xff]  ;;  %v468_v41 = vlaneseq  ;;  %vm596_vm7 = vcmask 7168  }
  0x14   : > { %v236_v2 = vpack.c.bf16 %v225_v1, %v224_v0  ;;  %v227_v6 = vld [vmem:[%s1650_s0 + $0x18] sm:$0xff]  ;;  %v343_v14 = vld [vmem:[%s1651_s1] sm:$0xff]  ;;  %v344_v15 = vld [vmem:[%s1651_s1 + $0x8] sm:$0xff]  ;;  %vm637_vm8 = vcmask 252928   ;;  %vm1265_vm12 = vmmov 0   ;;  %vm781_vm13 = vcmask 261120  }
  0x15   : > { %s1069_s10 = sshll.u32 %s219_s9, 4  ;;  %v237_v8 = vpack.c.bf16 %v227_v6, %v226_v3  ;;  %v357_v16 = vpack.c.bf16 %v344_v15, %v343_v14  ;;  %v1379_v43 = vshrl.u32 %v468_v41, 7  ;;  %s1263_s9 = smov 31  }
  0x16   : > { %1103 = vmatprep.mubr.msk.bf16.mxu1 %vm238_vm0, %v236_v2  ;;  %1097 = vmatprep.mubr.msk.bf16.mxu0 %vm238_vm0, %v236_v2  ;;  %s222_s13 = scalar_lea.vmem %s1654_s4, %s1069_s10  ;;  %s1070_s10 = sshll.u32 %s1320_s22, 8 }
  0x17   : > { %v228_v4 = vld [vmem:[%s222_s13] sm:$0xff]  ;;  %v229_v5 = vld [vmem:[%s222_s13 + $0x8] sm:$0xff]  ;;  %v472_v45 = vadd.s32 24, %v1379_v43  ;;  %v1383_v47 = vadd.s32 4294967295, %v1379_v43  ;;  %vm534_vm2 = vcmp.lt.s32.totalorder %v1379_v43, 1  ;;  %vm555_vm4 = vcmp.lt.s32.totalorder %v1379_v43, 7  ;;  %s1607_s13 = scalar_lea.hbm %s1655_s5, %s1070_s10 }
  0x18   : > { %v230_v7 = vpack.c.bf16 %v229_v5, %v228_v4  ;;  %v1264_v43 = vmov 0.0  }
  0x19   : > { %v1385_v51 = vadd.s32 1, %v472_v45  ;;  %vm479_vm1 = vcmp.ge.s32.totalorder %v1383_v47, 0 }
  0x1a   : > { %1101 = vmatprep.subr.bf16.mxu1 %v230_v7  ;;  %v231_v9 = vunpack.c.l.bf16 %v230_v7  ;;  %v232_v10 = vunpack.c.h.bf16 %v230_v7 }
  0x1b   : > { %1102 = vmatpush3.bf16.msra.mxu1 %v230_v7  ;;  %vm514_vm3 = vcmp.lt.s32.totalorder %v1385_v51, 32 }
  0x1c   : > { %v233_v11 = vsub.f32 %v228_v4, %v231_v9  ;;  %v234_v12 = vsub.f32 %v229_v5, %v232_v10  ;;  %1113 = vmatprep.subr.bf16.mxu1 %v357_v16 }
  0x1e   : > { %1104 = vmatmul.mubr.msk.bf16.vlgmr.msra.gmra.mxu1 %vm238_vm0, %v237_v8  ;;  %v235_v13 = vpack.c.bf16 %v234_v12, %v233_v11 }
  0x1f   : > { %1114 = vmatpush3.bf16.msra.mxu1 %v357_v16 }
  0x20   : > { %1095 = vmatprep.subr.bf16.mxu0 %v235_v13  ;;  %1127 = vmatprep.subr.bf16.mxu1 %v1264_v43 }
  0x21   : > { %1096 = vmatpush3.bf16.msra.mxu0 %v235_v13 }
  0x22   : > { %1107 = vmatprep.subr.bf16.mxu0 %v357_v16 }
  0x24   : > { %1098 = vmatmul.mubr.msk.bf16.vlgmr.msra.gmra.mxu0 %vm238_vm0, %v237_v8 }
  0x25   : > { %1108 = vmatpush3.bf16.msra.mxu0 %v357_v16 }
  0x26   : > { %1119 = vmatprep.subr.bf16.mxu0 %v1264_v43 }
  0xde   : > { %v1105_v17 = vpop.f32.mrf.mxu1 }
  0xe0   : > { %v328_v18 = vpop.f32.mrf.mxu1 }
  0xe2   : > { %v1106_v20 = vpop.f32.mrf.mxu1 }
  0xe4   : > { %v1099_v19 = vpop.f32.mrf.mxu0  ;;  %v331_v25 = vpop.f32.mrf.mxu1 }
  0xe5   : > { %v337_v23 = vadd.f32 %v1105_v17, %v1099_v19 }
  0xe6   : > { %v279_v21 = vpop.f32.mrf.mxu0 }
  0xe7   : > { %v329_v27 = vadd.f32 %v328_v18, %v279_v21 }
  0xe8   : > { %v1100_v22 = vpop.f32.mrf.mxu0 }
  0xe9   : > { %v340_v24 = vadd.f32 %v1106_v20, %v1100_v22 }
  0xea   : > { %v282_v26 = vpop.f32.mrf.mxu0 }
  0xeb   : > { %v346_v28 = vpack.c.bf16 %v340_v24, %v337_v23  ;;  %v332_v29 = vadd.f32 %v331_v25, %v282_v26 }
  0xed   : > { %v349_v30 = vunpack.c.l.bf16 %v346_v28  ;;  %v350_v31 = vunpack.c.h.bf16 %v346_v28  ;;  %v345_v32 = vpack.c.bf16 %v332_v29, %v329_v27 }
  0xef   : > { %v347_v33 = vunpack.c.l.bf16 %v345_v32  ;;  %v348_v34 = vunpack.c.h.bf16 %v345_v32  ;;  %1115 = vmatprep.mubr.msk.bf16.mxu1 %vm238_vm0, %v345_v32  ;;  %v353_v35 = vsub.f32 %v337_v23, %v349_v30  ;;  %v354_v36 = vsub.f32 %v340_v24, %v350_v31 }
  0xf0   : > { %1116 = vmatmul.mubr.msk.bf16.vlgmr.msra.gmra.mxu1 %vm238_vm0, %v346_v28  ;;  %v1434_v24 = vand.u32 127, %v468_v41 }
  0xf1   : > { %v351_v37 = vsub.f32 %v329_v27, %v347_v33  ;;  %v352_v38 = vsub.f32 %v332_v29, %v348_v34  ;;  %v356_v40 = vpack.c.bf16 %v354_v36, %v353_v35  ;;  %1131 = vmatprep.mubr.msk.bf16.mxu1 %vm1265_vm12, %v1264_v43 }
  0xf2   : > { %v519_v27 = vadd.s32 4294967295, %v1434_v24  ;;  %v1438_v30 = vadd.s32 1, %v1434_v24  ;;  %vm524_vm10 = vcmp.lt.s32.totalorder %v1434_v24, 32  ;;  %v767_v24 = vld [vmem:[%s1652_s2 + $0x8] sm:$0xff] }
  0xf3   : > { %v355_v39 = vpack.c.bf16 %v352_v38, %v351_v37 }
  0xf4   : > { %vm520_vm5 = vcmp.ge.s32.totalorder %v519_v27, 0  ;;  %vm521_vm6 = vcmp.lt.s32.totalorder %v519_v27, 32  ;;  %vm528_vm11 = vcmp.lt.s32.totalorder %v1438_v30, 32 }
  0xf5   : > { %1109 = vmatprep.mubr.msk.bf16.mxu0 %vm238_vm0, %v355_v39  ;;  %vm1440_vm9 = vmand %vm520_vm5, %vm521_vm6 }
  0xf6   : > { %1110 = vmatmul.mubr.msk.bf16.vlgmr.msra.gmra.mxu0 %vm238_vm0, %v356_v40 }
  0xf7   : > { %1123 = vmatprep.mubr.msk.bf16.mxu0 %vm1265_vm12, %v1264_v43 }
 0x1b0   : > { %v1117_v42 = vpop.f32.mrf.mxu1 }
 0x1b2   : > { %v453_v44 = vpop.f32.mrf.mxu1 }
 0x1b4   : > { %v1118_v48 = vpop.f32.mrf.mxu1 }
 0x1b6   : > { %v1111_v46 = vpop.f32.mrf.mxu0  ;;  %v456_v56 = vpop.f32.mrf.mxu1 }
 0x1b7   : > { %v462_v49 = vadd.f32 %v1117_v42, %v1111_v46 }
 0x1b8   : > { %v398_v50 = vpop.f32.mrf.mxu0 }
 0x1b9   : > { %v454_v52 = vadd.f32 %v453_v44, %v398_v50  ;;  %v532_v55 = vrot.slane %v462_v49, 7  ;;  %v553_v13 = vrot.slane %v462_v49, 1 }
 0x1ba   : > { %v1112_v53 = vpop.f32.mrf.mxu0 }
 0x1bb   : > { %v465_v54 = vadd.f32 %v1118_v48, %v1112_v53  ;;  %v530_v57 = vrot.slane %v454_v52, 7  ;;  %v551_v59 = vrot.slane %v454_v52, 1 }
 0x1bc   : > { %v401_v58 = vpop.f32.mrf.mxu0 }
 0x1bd   : > { %v533_v60 = vrot.slane %v465_v54, 7  ;;  %v554_v61 = vrot.slane %v465_v54, 1  ;;  %v457_v62 = vadd.f32 %v456_v56, %v401_v58 }
 0x1bf   : > { %v535_v63 = vsel %vm534_vm2, %v532_v55, %v533_v60  ;;  %v538_v0 = vsel %vm534_vm2, %v533_v60, %v530_v57  ;;  %v559_v1 = vsel %vm555_vm4, %v554_v61, %v551_v59  ;;  %v531_v5 = vrot.slane %v457_v62, 7 }
 0x1c0   : > { %v539_v2 = vsel %vm479_vm1, %v538_v0, 1e+30  ;;  %v550_v3 = vmin.f32 %v535_v63, %v465_v54  ;;  %v563_v4 = vsel %vm514_vm3, %v559_v1, 1e+30  ;;  %v552_v6 = vrot.slane %v457_v62, 1 }
 0x1c1   : > { %v547_v7 = vmin.f32 %v539_v2, %v454_v52  ;;  %v537_v9 = vsel %vm534_vm2, %v530_v57, %v531_v5  ;;  %v536_v14 = vsel %vm534_vm2, %v531_v5, %v532_v55  ;;  %v556_v18 = vsel %vm555_vm4, %v553_v13, %v554_v61 }
 0x1c2   : > { %v567_v8 = vmin.f32 %v550_v3, %v563_v4  ;;  %v558_v10 = vsel %vm555_vm4, %v551_v59, %v552_v6  ;;  %v548_v11 = vmin.f32 %v537_v9, %v457_v62  ;;  %v557_v15 = vsel %vm555_vm4, %v552_v6, %v553_v13 }
 0x1c3   : > { %v1407_v12 = vmin.f32 %v547_v7, %v558_v10  ;;  %v549_v16 = vmin.f32 %v536_v14, %v462_v49 }
 0x1c4   : > { %619 = vrot.lane.b32.xlu0 %v567_v8, %s1260_s6  ;;  %578 = vrot.lane.b32.xlu1 %v567_v8, %s1261_s7  ;;  %v565_v17 = vmin.f32 %v548_v11, %v557_v15  ;;  %v608_v41 = vsel %vm524_vm10, %v567_v8, 1e+30 }
 0x1c5   : > { %v566_v19 = vmin.f32 %v549_v16, %v556_v18  ;;  %v605_v2 = vsel %vm524_vm10, %v1407_v12, 1e+30 }
 0x1c6   : > { %v606_v50 = vsel %vm524_vm10, %v565_v17, 1e+30 }
 0x1c7   : > { %v607_v52 = vsel %vm524_vm10, %v566_v19, 1e+30 }
 0x1c8   : > { %590 = vrot.lane.b32.xlu1 %v567_v8, %s1262_s8  ;;  %572 = vrot.lane.b32.xlu0 %v1407_v12, %s1261_s7 }
 0x1cc   : > { %631 = vrot.lane.b32.xlu1 %v567_v8, %s1263_s9  ;;  %574 = vrot.lane.b32.xlu0 %v565_v17, %s1261_s7 }
 0x1d0   : > { %584 = vrot.lane.b32.xlu1 %v1407_v12, %s1262_s8  ;;  %576 = vrot.lane.b32.xlu0 %v566_v19, %s1261_s7 }
 0x1d4   : > { %586 = vrot.lane.b32.xlu1 %v565_v17, %s1262_s8  ;;  %588 = vrot.lane.b32.xlu0 %v566_v19, %s1262_s8 }
 0x1d8   : > { %617 = vrot.lane.b32.xlu1 %v566_v19, %s1260_s6  ;;  %615 = vrot.lane.b32.xlu0 %v565_v17, %s1260_s6 }
 0x1dc   : > { %627 = vrot.lane.b32.xlu1 %v565_v17, %s1263_s9  ;;  %629 = vrot.lane.b32.xlu0 %v566_v19, %s1263_s9 }
 0x1e0   : > { %625 = vrot.lane.b32.xlu1 %v1407_v12, %s1263_s9  ;;  %613 = vrot.lane.b32.xlu0 %v1407_v12, %s1260_s6 }
 0x236   : > { %v620_v20 = vpop.permute.xlu0 %619  ;;  %v579_v21 = vpop.permute.xlu1 %578 }
 0x23a   : > { %v591_v22 = vpop.permute.xlu1 %590  ;;  %v573_v23 = vpop.permute.xlu0 %572 }
 0x23b   : > { %v600_v32 = vsel %vm596_vm7, %v579_v21, %v591_v22 }
 0x23c   : > { %v604_v36 = vsel %vm1440_vm9, %v600_v32, 1e+30 }
 0x23d   : > { %v612_v44 = vmin.f32 %v604_v36, %v608_v41 }
 0x23e   : > { %v632_v25 = vpop.permute.xlu1 %631  ;;  %v575_v26 = vpop.permute.xlu0 %574 }
 0x23f   : > { %v641_v35 = vsel %vm637_vm8, %v620_v20, %v632_v25 }
 0x240   : > { %v645_v42 = vsel %vm528_vm11, %v641_v35, 1e+30 }
 0x241   : > { %v649_v48 = vmin.f32 %v612_v44, %v645_v42 }
 0x242   : > { %v585_v28 = vpop.permute.xlu1 %584  ;;  %v577_v29 = vpop.permute.xlu0 %576 }
 0x243   : > { %v597_v49 = vsel %vm596_vm7, %v573_v23, %v585_v28  ;;  %v653_v0 = vrot.slane %v649_v48, 7  ;;  %v673_v1 = vrot.slane %v649_v48, 1 }
 0x244   : > { %v601_v61 = vsel %vm1440_vm9, %v597_v49, 1e+30 }
 0x245   : > { %v609_v9 = vmin.f32 %v601_v61, %v605_v2 }
 0x246   : > { %v587_v33 = vpop.permute.xlu1 %586  ;;  %v589_v34 = vpop.permute.xlu0 %588 }
 0x247   : > { %v598_v37 = vsel %vm596_vm7, %v575_v26, %v587_v33  ;;  %v599_v38 = vsel %vm596_vm7, %v577_v29, %v589_v34 }
 0x248   : > { %v602_v45 = vsel %vm1440_vm9, %v598_v37, 1e+30  ;;  %v603_v46 = vsel %vm1440_vm9, %v599_v38, 1e+30 }
 0x249   : > { %v610_v55 = vmin.f32 %v602_v45, %v606_v50  ;;  %v611_v56 = vmin.f32 %v603_v46, %v607_v52 }
 0x24a   : > { %v618_v39 = vpop.permute.xlu1 %617  ;;  %v616_v40 = vpop.permute.xlu0 %615 }
 0x24e   : > { %v628_v53 = vpop.permute.xlu1 %627  ;;  %v630_v54 = vpop.permute.xlu0 %629 }
 0x24f   : > { %v639_v57 = vsel %vm637_vm8, %v616_v40, %v628_v53  ;;  %v640_v58 = vsel %vm637_vm8, %v618_v39, %v630_v54 }
 0x250   : > { %v643_v59 = vsel %vm528_vm11, %v639_v57, 1e+30  ;;  %v644_v60 = vsel %vm528_vm11, %v640_v58, 1e+30 }
 0x251   : > { %v647_v62 = vmin.f32 %v610_v55, %v643_v59  ;;  %v648_v63 = vmin.f32 %v611_v56, %v644_v60 }
 0x252   : > { %v626_v3 = vpop.permute.xlu1 %625  ;;  %v614_v4 = vpop.permute.xlu0 %613 }
 0x253   : > { %v651_v5 = vrot.slane %v647_v62, 7  ;;  %v671_v6 = vrot.slane %v647_v62, 1  ;;  %v652_v7 = vrot.slane %v648_v63, 7  ;;  %v672_v8 = vrot.slane %v648_v63, 1 }
 0x254   : > { %v638_v10 = vsel %vm637_vm8, %v614_v4, %v626_v3 }
 0x255   : > { %v654_v11 = vsel %vm534_vm2, %v652_v7, %v653_v0  ;;  %v655_v13 = vsel %vm534_vm2, %v651_v5, %v652_v7  ;;  %v674_v14 = vsel %vm555_vm4, %v672_v8, %v673_v1  ;;  %v675_v12 = vsel %vm555_vm4, %v671_v6, %v672_v8 }
 0x256   : > { %v668_v15 = vmin.f32 %v655_v13, %v648_v63  ;;  %v669_v16 = vmin.f32 %v654_v11, %v649_v48  ;;  %v642_v17 = vsel %vm528_vm11, %v638_v10, 1e+30 }
 0x257   : > { %v646_v18 = vmin.f32 %v609_v9, %v642_v17 }
 0x258   : > { %v684_v19 = vmin.f32 %v668_v15, %v674_v14 }
 0x259   : > { %v650_v20 = vrot.slane %v646_v18, 7  ;;  %v670_v21 = vrot.slane %v646_v18, 1 }
 0x25a   : > { %694 = vrot.lane.b32.xlu0 %v684_v19, %s1261_s7  ;;  %v724_v49 = vsel %vm524_vm10, %v684_v19, 1e+30 }
 0x25b   : > { %v656_v22 = vsel %vm534_vm2, %v650_v20, %v651_v5  ;;  %v657_v23 = vsel %vm534_vm2, %v653_v0, %v650_v20  ;;  %v676_v25 = vsel %vm555_vm4, %v670_v21, %v671_v6  ;;  %v677_v26 = vsel %vm555_vm4, %v673_v1, %v670_v21 }
 0x25c   : > { %v658_v27 = vsel %vm479_vm1, %v657_v23, 1e+30  ;;  %v667_v28 = vmin.f32 %v656_v22, %v647_v62  ;;  %v681_v29 = vsel %vm514_vm3, %v677_v26, 1e+30  ;;  %v766_v22 = vld [vmem:[%s1652_s2] sm:$0xff] }
 0x25d   : > { %v666_v32 = vmin.f32 %v658_v27, %v646_v18  ;;  %v685_v33 = vmin.f32 %v669_v16, %v681_v29 }
 0x25e   : > { %706 = vrot.lane.b32.xlu0 %v684_v19, %s1262_s8  ;;  %v1501_v34 = vmin.f32 %v667_v28, %v675_v12 }
 0x25f   : > { %v1503_v35 = vmin.f32 %v666_v32, %v676_v25  ;;  %696 = vrot.lane.b32.xlu1 %v685_v33, %s1261_s7  ;;  %v725_v50 = vsel %vm524_vm10, %v685_v33, 1e+30  ;;  %v780_v25 = vpack.c.bf16 %v767_v24, %v766_v22  ;;  %v869_v32 = vld [vmem:[%s1653_s3 + $0x10] sm:$0xff] }
 0x260   : > { %v723_v12 = vsel %vm524_vm10, %v1501_v34, 1e+30 }
 0x261   : > { %v722_v14 = vsel %vm524_vm10, %v1503_v35, 1e+30 }
 0x262   : > { %734 = vrot.lane.b32.xlu0 %v684_v19, %s1260_s6 }
 0x263   : > { %708 = vrot.lane.b32.xlu1 %v685_v33, %s1262_s8 }
 0x266   : > { %746 = vrot.lane.b32.xlu0 %v684_v19, %s1263_s9 }
 0x267   : > { %736 = vrot.lane.b32.xlu1 %v685_v33, %s1260_s6 }
 0x26a   : > { %690 = vrot.lane.b32.xlu0 %v1503_v35, %s1261_s7 }
 0x26b   : > { %748 = vrot.lane.b32.xlu1 %v685_v33, %s1263_s9  ;;  %v870_v33 = vld [vmem:[%s1653_s3 + $0x18] sm:$0xff] }
 0x26e   : > { %702 = vrot.lane.b32.xlu0 %v1503_v35, %s1262_s8 }
 0x26f   : > { %692 = vrot.lane.b32.xlu1 %v1501_v34, %s1261_s7 }
 0x272   : > { %730 = vrot.lane.b32.xlu0 %v1503_v35, %s1260_s6 }
 0x273   : > { %704 = vrot.lane.b32.xlu1 %v1501_v34, %s1262_s8 }
 0x276   : > { %742 = vrot.lane.b32.xlu0 %v1503_v35, %s1263_s9  ;;  %v867_v35 = vld [vmem:[%s1653_s3] sm:$0xff] }
 0x277   : > { %732 = vrot.lane.b32.xlu1 %v1501_v34, %s1260_s6  ;;  %s215_s6 = sand.u32 1, %s1250_s19  }
 0x278   : > { %s1049_s7 = sshll.u32 %s215_s6, 4  ;;  %s1610_s14 = scalar_lea.sflag [#allocation3], %s215_s6 }
 0x279   : > { %s217_s8 = scalar_lea.vmem [#allocation2], %s1049_s7 }
 0x27b   : > { %744 = vrot.lane.b32.xlu1 %v1501_v34, %s1263_s9  ;;  %v878_v34 = vpack.c.bf16 %v870_v33, %v869_v32  ;;  %s983_s9 = sshll.u32 %s217_s8, 4  ;;  %s1602_s9 = int_to_ptr.vmem [resolvable:$true] %s983_s9 }
 0x27c   : > { %s1198_s22 = scalar_lea.vmem %s1602_s9, 256  ;;  %p1205_p0 = scmp.lt.s32.totalorder %s1602_s9, %s1203_s16 }
 0x27d   : > { %p1199_p11 = scmp.ne.s32.totalorder %s1602_s9, %s1198_s22  ;;  %p1206_p1 = scmp.lt.s32.totalorder %s1204_s17, %s1198_s22 }
 0x27f   : > { %p1200_p12 = pnand %p1199_p11, %p1337_p5  ;;  %p1207_p2 = por %p1206_p1, %p1205_p0 }
 0x281   : > { %p1201_p13 = pneg %p1200_p12 }
 0x283   : > { %p1208_p3 = pnand %p1207_p2, %p1201_p13 }
 0x2cc   : > { %v695_v47 = vpop.permute.xlu0 %694 }
 0x2d0   : > { %v707_v51 = vpop.permute.xlu0 %706 }
 0x2d1   : > { %v697_v36 = vpop.permute.xlu1 %696  ;;  %v716_v39 = vsel %vm596_vm7, %v695_v47, %v707_v51  ;;  %v868_v47 = vld [vmem:[%s1653_s3 + $0x8] sm:$0xff] }
 0x2d2   : > { %v720_v45 = vsel %vm1440_vm9, %v716_v39, 1e+30  ;;  %v877_v51 = vpack.c.bf16 %v868_v47, %v867_v35 }
 0x2d3   : > { %v728_v54 = vmin.f32 %v720_v45, %v724_v49 }
 0x2d4   : > { %v735_v37 = vpop.permute.xlu0 %734 }
 0x2d5   : > { %v709_v38 = vpop.permute.xlu1 %708 }
 0x2d6   : > { %v717_v40 = vsel %vm596_vm7, %v697_v36, %v709_v38 }
 0x2d7   : > { %v721_v46 = vsel %vm1440_vm9, %v717_v40, 1e+30 }
 0x2d8   : > { %v747_v41 = vpop.permute.xlu0 %746  ;;  %v729_v55 = vmin.f32 %v721_v46, %v725_v50 }
 0x2d9   : > { %v737_v42 = vpop.permute.xlu1 %736  ;;  %v756_v44 = vsel %vm637_vm8, %v735_v37, %v747_v41 }
 0x2da   : > { %v760_v52 = vsel %vm528_vm11, %v756_v44, 1e+30 }
 0x2db   : > { %v764_v58 = vmin.f32 %v728_v54, %v760_v52 }
 0x2dc   : > { %v691_v48 = vpop.permute.xlu0 %690 }
 0x2dd   : > { %v749_v53 = vpop.permute.xlu1 %748 }
 0x2de   : > { %v757_v56 = vsel %vm637_vm8, %v737_v42, %v749_v53 }
 0x2df   : > { %v761_v57 = vsel %vm528_vm11, %v757_v56, 1e+30 }
 0x2e0   : > { %v765_v59 = vmin.f32 %v729_v55, %v761_v57  ;;  %v703_v60 = vpop.permute.xlu0 %702 }
 0x2e1   : > { %v693_v61 = vpop.permute.xlu1 %692  ;;  %v714_v5 = vsel %vm596_vm7, %v691_v48, %v703_v60 }
 0x2e2   : > { %v769_v62 = vpack.c.bf16 %v765_v59, %v764_v58  ;;  %v718_v11 = vsel %vm1440_vm9, %v714_v5, 1e+30 }
 0x2e3   : > { %v726_v17 = vmin.f32 %v718_v11, %v722_v14 }
 0x2e4   : > { %v772_v63 = vunpack.c.l.bf16 %v769_v62  ;;  %v773_v0 = vunpack.c.h.bf16 %v769_v62  ;;  %1128 = vmatpush3.bf16.msra.mxu1 %v769_v62  ;;  %v731_v1 = vpop.permute.xlu0 %730 }
 0x2e5   : > { %v705_v2 = vpop.permute.xlu1 %704  ;;  %1129 = vmatprep.subr.bf16.mxu1 %v1264_v43 }
 0x2e6   : > { %v777_v3 = vsub.f32 %v765_v59, %v773_v0  ;;  %v776_v4 = vsub.f32 %v764_v58, %v772_v63  ;;  %v715_v6 = vsel %vm596_vm7, %v693_v61, %v705_v2 }
 0x2e7   : > { %v719_v13 = vsel %vm1440_vm9, %v715_v6, 1e+30 }
 0x2e8   : > { %v743_v7 = vpop.permute.xlu0 %742  ;;  %v779_v8 = vpack.c.bf16 %v777_v3, %v776_v4  ;;  %v727_v18 = vmin.f32 %v719_v13, %v723_v12 }
 0x2e9   : > { %v733_v9 = vpop.permute.xlu1 %732  ;;  %v754_v10 = vsel %vm637_vm8, %v731_v1, %v743_v7 }
 0x2ea   : > { %1120 = vmatpush3.bf16.msra.mxu0 %v779_v8  ;;  %v758_v15 = vsel %vm528_vm11, %v754_v10, 1e+30 }
 0x2eb   : > { %1121 = vmatprep.subr.bf16.mxu0 %v1264_v43  ;;  %v762_v20 = vmin.f32 %v726_v17, %v758_v15 }
 0x2ed   : > { %v745_v16 = vpop.permute.xlu1 %744 }
 0x2ee   : > { %v755_v19 = vsel %vm637_vm8, %v733_v9, %v745_v16 }
 0x2ef   : > { %v759_v31 = vsel %vm528_vm11, %v755_v19, 1e+30 }
 0x2f0   : > { %v763_v21 = vmin.f32 %v727_v18, %v759_v31 }
 0x2f2   : > { %v768_v23 = vpack.c.bf16 %v763_v21, %v762_v20 }
 0x2f4   : > { %v770_v26 = vunpack.c.l.bf16 %v768_v23  ;;  %v771_v27 = vunpack.c.h.bf16 %v768_v23  ;;  %1130 = vmatpush3.bf16.msra.mxu1 %v768_v23 }
 0x2f5   : > { %1143 = vmatprep.subr.bf16.mxu1 %v1264_v43 }
 0x2f6   : > { %v775_v30 = vsub.f32 %v763_v21, %v771_v27  ;;  %v774_v28 = vsub.f32 %v762_v20, %v770_v26 }
 0x2f7   : > { %1132 = vmatmul.mubr.msk.bf16.vlgmr.msra.gmra.mxu1 %vm781_vm13, %v780_v25 }
 0x2f8   : > { %v778_v29 = vpack.c.bf16 %v775_v30, %v774_v28  ;;  %1147 = vmatprep.mubr.msk.bf16.mxu1 %vm1265_vm12, %v1264_v43  ;;  %1144 = vmatpush3.bf16.msra.mxu1 %v878_v34 }
 0x2f9   : > { %1145 = vmatprep.subr.bf16.mxu1 %v1264_v43 }
 0x2fa   : > { %1122 = vmatpush3.bf16.msra.mxu0 %v778_v29 }
 0x2fb   : > { %1135 = vmatprep.subr.bf16.mxu0 %v1264_v43 }
 0x2fc   : > { %1146 = vmatpush3.bf16.msra.mxu1 %v877_v51 }
 0x2fd   : > { %1124 = vmatmul.mubr.msk.bf16.vlgmr.msra.gmra.mxu0 %vm781_vm13, %v780_v25 }
 0x2fe   : > { %1139 = vmatprep.mubr.msk.bf16.mxu0 %vm1265_vm12, %v1264_v43  ;;  %1136 = vmatpush3.bf16.msra.mxu0 %v878_v34 }
 0x2ff   : > { %1137 = vmatprep.subr.bf16.mxu0 %v1264_v43 }
 0x302   : > { %1138 = vmatpush3.bf16.msra.mxu0 %v877_v51 }
 0x3b7   : > { %v860_v36 = vpop.f32.mrf.mxu1 }
 0x3b9   : > { %v1133_v37 = vpop.f32.mrf.mxu1 }
 0x3bb   : > { %v863_v38 = vpop.f32.mrf.mxu1 }
 0x3bd   : > { %v819_v39 = vpop.f32.mrf.mxu0  ;;  %v1134_v40 = vpop.f32.mrf.mxu1 }
 0x3be   : > { %v861_v44 = vadd.f32 %v860_v36, %v819_v39 }
 0x3bf   : > { %v1125_v41 = vpop.f32.mrf.mxu0 }
 0x3c1   : > { %v822_v42 = vpop.f32.mrf.mxu0 }
 0x3c2   : > { %v864_v45 = vadd.f32 %v863_v38, %v822_v42 }
 0x3c3   : > { %v1126_v46 = vpop.f32.mrf.mxu0 }
 0x3c4   : > { %v871_v48 = vpack.c.bf16 %v864_v45, %v861_v44 }
 0x3c6   : > { %v872_v49 = vunpack.c.l.bf16 %v871_v48  ;;  %v873_v50 = vunpack.c.h.bf16 %v871_v48  ;;  %1148 = vmatmul.mubr.msk.bf16.vlgmr.msra.gmra.mxu1 %vm781_vm13, %v871_v48 }
 0x3c8   : > { %v874_v43 = vsub.f32 %v861_v44, %v872_v49  ;;  %v875_v52 = vsub.f32 %v864_v45, %v873_v50 }
 0x3ca   : > { %v876_v53 = vpack.c.bf16 %v875_v52, %v874_v43 }
 0x3cc   : > { %1140 = vmatmul.mubr.msk.bf16.vlgmr.msra.gmra.mxu0 %vm781_vm13, %v876_v53 }
 0x486   : > { %v960_v54 = vpop.f32.mrf.mxu1 }
 0x488   : > { %v1149_v55 = vpop.f32.mrf.mxu1 }
 0x48a   : > { %v963_v56 = vpop.f32.mrf.mxu1 }
 0x48c   : > { %v916_v57 = vpop.f32.mrf.mxu0  ;;  %v1150_v58 = vpop.f32.mrf.mxu1 }
 0x48d   : > { %v961_v59 = vadd.f32 %v960_v54, %v916_v57 }
 0x48e   : > { %v1141_v60 = vpop.f32.mrf.mxu0 }
 0x48f   : > { %967 = vst.msk [vmem:[%s217_s8] sm:$0xff] %vm238_vm0, %v961_v59 }
 0x490   : > { %v919_v61 = vpop.f32.mrf.mxu0 }
 0x491   : > { %v964_v62 = vadd.f32 %v963_v56, %v919_v61 }
 0x492   : > { %v1142_v63 = vpop.f32.mrf.mxu0 }
 0x493   : > { %968 = vst.msk [vmem:[%s217_s8 + $0x8] sm:$0xff] %vm238_vm0, %v964_v62 }
 0x494   : > { %1211 = shalt.err (!%p1208_p3)
}
 0x495   : > { %s1212_s23 = scalar_lea.hbm %s1607_s13, 256  ;;  %s1216_s30 = scalar_lea.hbm %s1655_s5, 512 }
 0x496   : > { %p1213_p4 = scmp.ne.s32.totalorder %s1607_s13, %s1212_s23  ;;  %p1217_p9 = scmp.lt.s32.totalorder %s1607_s13, %s1655_s5 }
 0x497   : > { %p1218_p10 = scmp.lt.s32.totalorder %s1216_s30, %s1212_s23 }
 0x498   : > { %p1214_p7 = pnand %p1213_p4, %p1337_p5 }
 0x499   : > { %p1219_p11 = por %p1218_p10, %p1217_p9 }
 0x49a   : > { %p1215_p8 = pneg %p1214_p7 }
 0x49c   : > { %p1220_p12 = pnand %p1219_p11, %p1215_p8 }
 0x49e   : > { %1223 = shalt.err (!%p1220_p12)
}
 0x49f   : > { %s1267_s8 = smov 128   ;;  %s1268_s10 = smov 8  }
 0x4a0   : > { %1151 = dma.vmem_to_hbm [thread:$0]  (%p1337_p5), %s1602_s9, 256, %s1607_s13, %s1610_s14, %s1267_s8, %s1267_s8, %s1268_s10  }
 0x4a1 PF: > { %p1157_p13 = scmp.ge.s32.totalorder %s1258_s21, 2  ;;  %s998_s11 = sand.u32 1, %s1246_s18  }
 0x4a2   : > { %s999_s12 = scalar_lea.sflag [#allocation3], %s998_s11 }
 0x4a3   : > { %p1154_p0 = pnand %p1157_p13, %p1341_p6 }
 0x4a5   : > { %p1155_p1 = pneg %p1154_p0 }
 0x4a7   : > { %1241 = dma.done.wait (%p1155_p1), %s999_s12, 256  }
 0x4a8   : > { %1243 = vsyncadd (%p1155_p1), %s999_s12, 4294967040  ;;  %p15_p2 = scmp.ge.s32.totalorder %s1324_s24, 4   ;;  %s1660_s18 = smov %s1250_s19 }
 0x4a9   : > { %s1661_s19 = smov %s1254_s20  ;;  %s1662_s20 = smov %s1335_s27 }
 0x4aa   : > { %s1663_s21 = smov %s1324_s24  ;;  %17 = sbr.rel (!%p15_p2) target bundleno = 3 (0x3), region = 75 }
 0x4af   :  { %1004 = vsyncpa [#allocation3], 1 }
 0x4b0   :  { %1006 = vsyncpa [#allocation3 + $0x1], 1 }

</bundles_post_ra>
